<compile_context>
chip_gen: v6e
topology: v6e:2x2x1
jax: 0.10.0
libtpu: 0.0.40
codegen_flags: <defaults>
</compile_context>

<pallas_src>
import jax
import jax.numpy as jnp
from jax.experimental import pallas as pl
from jax.experimental.pallas import tpu as pltpu


def attention_kernel(seq_ref, w_ref, out_ref, m_sc, l_sc, acc_sc):
    # seq_ref : (Bb, Tt, D) VMEM block of input rows
    # w_ref   : (1, D)      attention projection weight, stored as a row
    # out_ref : (Bb, D)     pooled output block (lane-dense), resident over kt
    # m_sc/l_sc : (Bb, 1)   online-softmax running max / denominator
    # acc_sc    : (Bb, D)   running un-normalized weighted sum
    kt = pl.program_id(1)

    @pl.when(kt == 0)
    def _init():
        m_sc[...] = jnp.full_like(m_sc, -jnp.inf)
        l_sc[...] = jnp.zeros_like(l_sc)
        acc_sc[...] = jnp.zeros_like(acc_sc)

    seq = seq_ref[...]                                     # (Bb, Tt, D)
    w_row = w_ref[...]                                     # (1, D)

    # Linear(D, 1) as a VPU multiply + lane reduce over D -> lane-dense (Bb, Tt).
    # Bias omitted: softmax over T is shift-invariant, so it is a no-op here.
    scores = jnp.sum(seq * w_row, axis=-1)                 # (Bb, Tt)

    # Online softmax update over the T grid axis, all on (Bb, Tt) / (Bb, 1).
    m_prev = m_sc[...]                                     # (Bb, 1)
    m_new = jnp.maximum(m_prev, jnp.max(scores, axis=-1, keepdims=True))
    alpha = jnp.exp(m_prev - m_new)                        # (Bb, 1)
    e = jnp.exp(scores - m_new)                            # (Bb, Tt)

    l_sc[...] = alpha * l_sc[...] + jnp.sum(e, axis=-1, keepdims=True)
    # Un-normalized weighted sum over this T tile; normalize once in the epilogue.
    acc_sc[...] = alpha * acc_sc[...] + jnp.sum(seq * e[:, :, None], axis=1)
    m_sc[...] = m_new

    @pl.when(kt == pl.num_programs(1) - 1)
    def _finalize():
        # Exact divide: denominator is only Bb scalars, accuracy costs nothing.
        out_ref[...] = (acc_sc[...] / l_sc[...]).astype(out_ref.dtype)


def _tile_budget_bytes():
    """Per-tile VMEM budget, generation-aware when hardware info is available."""
    try:
        vmem_bytes = pltpu.get_tpu_info().vmem_capacity_bytes
    except Exception:
        vmem_bytes = 64 << 20  # assume the smallest (v7x-class) if unknown
    # v7x: 64 MiB physical / 32 MiB scoped -> 4 MiB tiles; v5e/v6e: 8 MiB tiles.
    return (4 << 20) if vmem_bytes <= (64 << 20) else (8 << 20)


def _aligned_divisors(n):
    # Divisors usable as a block size: full extent, or a multiple of 8
    # (sublane tiling of the (Bb, D) output / (Tt, D) input blocks).
    return [d for d in range(1, n + 1) if n % d == 0 and (d == n or d % 8 == 0)]


def _choose_blocks(B, T, D, itemsize, tile_budget_bytes):
    """Pick (Bb, Tt) so the seq tile fits the VMEM budget and the grid has
    enough steps for megacore sharding + DMA pipelining (prefer >= 4 steps)."""
    bb_cands = _aligned_divisors(B)
    tt_cands = _aligned_divisors(T)
    min_bb = min(bb_cands)

    def tile_bytes(bb, tt):
        return bb * tt * D * itemsize

    fitting_tt = [t for t in tt_cands if tile_bytes(min_bb, t) <= tile_budget_bytes]
    tt = max(fitting_tt) if fitting_tt else min(tt_cands)

    fitting_bb = [b for b in bb_cands if tile_bytes(b, tt) <= tile_budget_bytes] or [min_bb]
    for min_steps in (4, 2, 1):  # 4 = 2 steps per TensorCore on v7x
        sel = [b for b in fitting_bb if (B // b) * (T // tt) >= min_steps]
        if sel:
            return max(sel), tt
    return max(fitting_bb), tt


def attention_forward(seq, w, b=None):
    """seq: (B, T, D) f32; w: (D, 1) f32; b ignored (softmax shift invariance) -> (B, D) f32."""
    del b  # mathematically a no-op for this module's forward pass
    B, T, D = seq.shape
    itemsize = jnp.dtype(seq.dtype).itemsize
    bb, tt = _choose_blocks(B, T, D, itemsize, _tile_budget_bytes())
    w_row = jnp.asarray(w, seq.dtype).reshape(1, D)  # lane-major weight row

    return pl.pallas_call(
        attention_kernel,
        out_shape=jax.ShapeDtypeStruct((B, D), seq.dtype),
        grid_spec=pltpu.PrefetchScalarGridSpec(
            num_scalar_prefetch=0,
            grid=(B // bb, T // tt),                       # (batch blocks, T blocks)
            in_specs=[
                pl.BlockSpec((bb, tt, D), lambda i, kt: (i, kt, 0)),  # seq tile
                pl.BlockSpec((1, D), lambda i, kt: (0, 0)),           # weight row
            ],
            out_specs=pl.BlockSpec((bb, D), lambda i, kt: (i, 0)),    # resident over kt
            scratch_shapes=[
                pltpu.VMEM((bb, 1), jnp.float32),   # running max  m
                pltpu.VMEM((bb, 1), jnp.float32),   # running sum  l
                pltpu.VMEM((bb, D), jnp.float32),   # running weighted sum
            ],
        ),
        compiler_params=pltpu.CompilerParams(
            dimension_semantics=("parallel", "arbitrary"),  # batch parallel, T reduction
            vmem_limit_bytes=32 << 20,                      # safe on v5e/v6e/v7x
        ),
    )(seq, w_row)


def attention_reference(seq, w, b):
    scores = jnp.einsum("btd,do->bto", seq, w)[..., 0] + b[0]   # (B, T)
    weights = jax.nn.softmax(scores, axis=1)                     # (B, T)
    return jnp.sum(seq * weights[..., None], axis=1)             # (B, D)


if __name__ == "__main__":
    key = jax.random.PRNGKey(0)
    k_seq, k_w, k_b = jax.random.split(key, 3)

    B, T, D = 2, 8, 32   # batch, seq_len, hidden dim

    seq = jax.random.normal(k_seq, (B, T, D), dtype=jnp.float32)
    # Deterministic "Linear(dim, 1)" params (synthetic init, PyTorch-like scale).
    bound = 1.0 / jnp.sqrt(jnp.float32(D))
    w = jax.random.uniform(k_w, (D, 1), dtype=jnp.float32, minval=-bound, maxval=bound)
    b = jax.random.uniform(k_b, (1,), dtype=jnp.float32, minval=-bound, maxval=bound)

    out = jax.block_until_ready(attention_forward(seq, w, b))
    ref = attention_reference(seq, w, b)

    assert out.shape == (B, D)
    # Exact-divide softmax: only f32 rounding / reassociation differences remain.
    assert jnp.allclose(out, ref, atol=1e-4, rtol=1e-4), "mismatch vs reference"

    print("KERNEL_OK")
</pallas_src>

<mosaic_0001>
module attributes {stable_mosaic.version = 11 : i64} {
  func.func @attention_kernel(%arg0: i32, %arg1: i32, %arg2: memref<2x8x32xf32, #tpu.memory_space<vmem>>, %arg3: memref<1x32xf32, #tpu.memory_space<vmem>>, %arg4: memref<2x32xf32, #tpu.memory_space<vmem>>, %arg5: memref<2x1xf32, #tpu.memory_space<vmem>>, %arg6: memref<2x1xf32, #tpu.memory_space<vmem>>, %arg7: memref<2x32xf32, #tpu.memory_space<vmem>>) attributes {dimension_semantics = [#tpu.dimension_semantics<parallel>, #tpu.dimension_semantics<arbitrary>], iteration_bounds = array<i64: 1, 1>, scalar_prefetch = 0 : i64, scratch_operands = 3 : i64, tpu.core_type = #tpu.core_type<tc>, window_params = [{transform_indices = @transform_0, window_bounds = array<i64: 2, 8, 32>}, {pipeline_mode = #tpu.pipeline_mode<synchronous>, transform_indices = @transform_1, window_bounds = array<i64: 1, 32>}, {transform_indices = @transform_2, window_bounds = array<i64: 2, 32>}]} {
    %c0_i32 = arith.constant 0 : i32
    %0 = arith.cmpi eq, %arg1, %c0_i32 : i32
    %1 = arith.extui %0 : i1 to i32
    %c0_i32_0 = arith.constant 0 : i32
    %2 = arith.cmpi ne, %1, %c0_i32_0 : i32
    scf.if %2 {
      %cst_22 = arith.constant 0xFF800000 : f32
      %37 = vector.broadcast %cst_22 : f32 to vector<2x1xf32>
      %c0_23 = arith.constant 0 : index
      %c0_24 = arith.constant 0 : index
      %38 = vector.load %arg5[%c0_23, %c0_24] : memref<2x1xf32, #tpu.memory_space<vmem>>, vector<2x1xf32>
      tpu.vector_store %arg5[%c0_23, %c0_24], %37 {strides = array<i32>} : memref<2x1xf32, #tpu.memory_space<vmem>>, vector<2x1xf32>,
      %cst_25 = arith.constant 0.000000e+00 : f32
      %39 = vector.broadcast %cst_25 : f32 to vector<2x1xf32>
      %c0_26 = arith.constant 0 : index
      %c0_27 = arith.constant 0 : index
      %40 = vector.load %arg6[%c0_26, %c0_27] : memref<2x1xf32, #tpu.memory_space<vmem>>, vector<2x1xf32>
      tpu.vector_store %arg6[%c0_26, %c0_27], %39 {strides = array<i32>} : memref<2x1xf32, #tpu.memory_space<vmem>>, vector<2x1xf32>,
      %cst_28 = arith.constant 0.000000e+00 : f32
      %41 = vector.broadcast %cst_28 : f32 to vector<2x32xf32>
      %c0_29 = arith.constant 0 : index
      %c0_30 = arith.constant 0 : index
      %42 = vector.load %arg7[%c0_29, %c0_30] : memref<2x32xf32, #tpu.memory_space<vmem>>, vector<2x32xf32>
      tpu.vector_store %arg7[%c0_29, %c0_30], %41 {strides = array<i32>} : memref<2x32xf32, #tpu.memory_space<vmem>>, vector<2x32xf32>,
    } else {
    }
    %c0 = arith.constant 0 : index
    %c0_1 = arith.constant 0 : index
    %c0_2 = arith.constant 0 : index
    %3 = vector.load %arg2[%c0, %c0_1, %c0_2] : memref<2x8x32xf32, #tpu.memory_space<vmem>>, vector<2x8x32xf32>
    %c0_3 = arith.constant 0 : index
    %c0_4 = arith.constant 0 : index
    %4 = vector.load %arg3[%c0_3, %c0_4] : memref<1x32xf32, #tpu.memory_space<vmem>>, vector<1x32xf32>
    %5 = vector.shape_cast %4 : vector<1x32xf32> to vector<1x1x32xf32>
    %6 = vector.broadcast %5 : vector<1x1x32xf32> to vector<2x8x32xf32>
    %7 = arith.mulf %3, %6 : vector<2x8x32xf32>
    %cst = arith.constant dense<0.000000e+00> : vector<2x8xf32>
    %8 = vector.multi_reduction <add>, %7, %cst [2] : vector<2x8x32xf32> to vector<2x8xf32>
    %c0_5 = arith.constant 0 : index
    %c0_6 = arith.constant 0 : index
    %9 = vector.load %arg5[%c0_5, %c0_6] : memref<2x1xf32, #tpu.memory_space<vmem>>, vector<2x1xf32>
    %cst_7 = arith.constant dense<0xFF800000> : vector<2xf32>
    %10 = vector.multi_reduction <maximumf>, %8, %cst_7 [1] : vector<2x8xf32> to vector<2xf32>
    %11 = vector.shape_cast %10 : vector<2xf32> to vector<2x1xf32>
    %12 = arith.maximumf %9, %11 : vector<2x1xf32>
    %13 = arith.subf %9, %12 : vector<2x1xf32>
    %14 = math.exp %13 : vector<2x1xf32>
    %15 = vector.broadcast %12 : vector<2x1xf32> to vector<2x8xf32>
    %16 = arith.subf %8, %15 : vector<2x8xf32>
    %17 = math.exp %16 : vector<2x8xf32>
    %c0_8 = arith.constant 0 : index
    %c0_9 = arith.constant 0 : index
    %18 = vector.load %arg6[%c0_8, %c0_9] : memref<2x1xf32, #tpu.memory_space<vmem>>, vector<2x1xf32>
    %19 = arith.mulf %14, %18 : vector<2x1xf32>
    %cst_10 = arith.constant dense<0.000000e+00> : vector<2xf32>
    %20 = vector.multi_reduction <add>, %17, %cst_10 [1] : vector<2x8xf32> to vector<2xf32>
    %21 = vector.shape_cast %20 : vector<2xf32> to vector<2x1xf32>
    %22 = arith.addf %19, %21 : vector<2x1xf32>
    %c0_11 = arith.constant 0 : index
    %c0_12 = arith.constant 0 : index
    %23 = vector.load %arg6[%c0_11, %c0_12] : memref<2x1xf32, #tpu.memory_space<vmem>>, vector<2x1xf32>
    tpu.vector_store %arg6[%c0_11, %c0_12], %22 {strides = array<i32>} : memref<2x1xf32, #tpu.memory_space<vmem>>, vector<2x1xf32>,
    %c0_13 = arith.constant 0 : index
    %c0_14 = arith.constant 0 : index
    %24 = vector.load %arg7[%c0_13, %c0_14] : memref<2x32xf32, #tpu.memory_space<vmem>>, vector<2x32xf32>
    %25 = vector.broadcast %14 : vector<2x1xf32> to vector<2x32xf32>
    %26 = arith.mulf %25, %24 : vector<2x32xf32>
    %27 = vector.shape_cast %17 : vector<2x8xf32> to vector<2x8x1xf32>
    %28 = vector.broadcast %27 : vector<2x8x1xf32> to vector<2x8x32xf32>
    %29 = arith.mulf %3, %28 : vector<2x8x32xf32>
    %cst_15 = arith.constant dense<0.000000e+00> : vector<2x32xf32>
    %30 = vector.multi_reduction <add>, %29, %cst_15 [1] : vector<2x8x32xf32> to vector<2x32xf32>
    %31 = arith.addf %26, %30 : vector<2x32xf32>
    %c0_16 = arith.constant 0 : index
    %c0_17 = arith.constant 0 : index
    %32 = vector.load %arg7[%c0_16, %c0_17] : memref<2x32xf32, #tpu.memory_space<vmem>>, vector<2x32xf32>
    tpu.vector_store %arg7[%c0_16, %c0_17], %31 {strides = array<i32>} : memref<2x32xf32, #tpu.memory_space<vmem>>, vector<2x32xf32>,
    %c0_18 = arith.constant 0 : index
    %c0_19 = arith.constant 0 : index
    %33 = vector.load %arg5[%c0_18, %c0_19] : memref<2x1xf32, #tpu.memory_space<vmem>>, vector<2x1xf32>
    tpu.vector_store %arg5[%c0_18, %c0_19], %12 {strides = array<i32>} : memref<2x1xf32, #tpu.memory_space<vmem>>, vector<2x1xf32>,
    %c0_i32_20 = arith.constant 0 : i32
    %34 = arith.cmpi eq, %arg1, %c0_i32_20 : i32
    %35 = arith.extui %34 : i1 to i32
    %c0_i32_21 = arith.constant 0 : i32
    %36 = arith.cmpi ne, %35, %c0_i32_21 : i32
    scf.if %36 {
      %c0_22 = arith.constant 0 : index
      %c0_23 = arith.constant 0 : index
      %37 = vector.load %arg7[%c0_22, %c0_23] : memref<2x32xf32, #tpu.memory_space<vmem>>, vector<2x32xf32>
      %c0_24 = arith.constant 0 : index
      %c0_25 = arith.constant 0 : index
      %38 = vector.load %arg6[%c0_24, %c0_25] : memref<2x1xf32, #tpu.memory_space<vmem>>, vector<2x1xf32>
      %39 = vector.broadcast %38 : vector<2x1xf32> to vector<2x32xf32>
      %40 = arith.divf %37, %39 : vector<2x32xf32>
      %c0_26 = arith.constant 0 : index
      %c0_27 = arith.constant 0 : index
      %41 = vector.load %arg4[%c0_26, %c0_27] : memref<2x32xf32, #tpu.memory_space<vmem>>, vector<2x32xf32>
      tpu.vector_store %arg4[%c0_26, %c0_27], %40 {strides = array<i32>} : memref<2x32xf32, #tpu.memory_space<vmem>>, vector<2x32xf32>,
    } else {
    }
    return
  }
  func.func @transform_0(%arg0: i32, %arg1: i32) -> (i32, i32, i32) {
    %c0_i32 = arith.constant 0 : i32
    %c0_i32_0 = arith.constant 0 : i32
    return %arg0, %arg1, %c0_i32 : i32, i32, i32
  }
  func.func @transform_1(%arg0: i32, %arg1: i32) -> (i32, i32) {
    %c0_i32 = arith.constant 0 : i32
    %c0_i32_0 = arith.constant 0 : i32
    %c0_i32_1 = arith.constant 0 : i32
    return %c0_i32, %c0_i32_0 : i32, i32
  }
  func.func @transform_2(%arg0: i32, %arg1: i32) -> (i32, i32) {
    %c0_i32 = arith.constant 0 : i32
    %c0_i32_0 = arith.constant 0 : i32
    return %arg0, %c0_i32 : i32, i32
  }
}

</mosaic_0001>

<bundles_post_ra>
// kernel: tpu_custom_call.1
= control target key start
LH: loop header
LB: loop body
LE: loop exit
PB: predicated region body
PF: predicated region fallthrough
CT: control target
= control target key end

     0   :  { %7 = vsyncpa [#allocation6], 0  ;;  %s301_s0 = inlined_call_operand.hbm [shape: f32[2,8,32], index: 0, kind: input, shape index: {}]   ;;  %s302_s1 = inlined_call_operand.vmem [shape: f32[1,32], index: 1, kind: input, shape index: {}]   ;;  %s303_s2 = inlined_call_operand.hbm [shape: f32[2,32], index: 2, kind: output, shape index: {}]  }
   0x1   :  { %8 = vsyncpa [#allocation7], 0  ;;  %s246_s9 = smov [#allocation5]  }
   0x2   :  { %s14_s10 = sshll.u32 %s246_s9, 4  ;;  %s15_s10 = int_to_ptr.vmem [resolvable:$true] %s14_s10 }
   0x3   :  { %s210_s11 = scalar_lea.vmem %s15_s10, 256  ;;  %p215_p1 = scmp.lt.s32.totalorder %s15_s10, %s15_s10 }
   0x4   :  { %p211_p0 = scmp.ne.s32.totalorder %s15_s10, %s210_s11  ;;  %p216_p2 = scmp.lt.s32.totalorder %s210_s11, %s210_s11 }
   0x6   :  { %p217_p3 = por %p216_p2, %p215_p1 }
   0x8   :  { %p218_p4 = pnand %p217_p3, %p211_p0 }
   0xa   :  { %221 = shalt.err (!%p218_p4)
}
   0xb   :  { %s247_s12 = smov 128   ;;  %s248_s13 = smov 8  }
   0xc   :  { %20 = dma.hbm_to_vmem [thread:$0]  %s301_s0, 256, %s15_s10, [#allocation6], %s247_s12, %s247_s12, %s248_s13  }
   0xd   :  { %242 = dma.done.wait [#allocation6], 256  }
   0xe   :  { %243 = vsyncadd [#allocation6], 4294967040  ;;  %v271_v0 = vld [vmem:[#allocation5] sm:$0xff]  ;;  %v184_v1 = vld [vmem:[%s302_s1] ss:$0 sm:$0xff]  ;;  %vm46_vm0 = vcmask 261120   ;;  %v56_v8 = vlaneseq }
   0xf   :  { %v276_v2 = vld [vmem:[#allocation5 + $0x8] sm:$0xff]  ;;  %v44_v3 = vmul.f32 %v184_v1, %v271_v0  ;;  %vm30_vm1 = vcmask 1024   ;;  %v249_v7 = vmov -inf   ;;  %vm66_vm2 = vcmask 1041409   ;;  %s252_s0 = smov [#allocation8]  }
  0x10   :  { %v45_v4 = vmul.f32 %v184_v1, %v276_v2  ;;  %31 = vst.msk [vmem:[#allocation2] sm:$0x3] %vm30_vm1, %v249_v7  ;;  %v57_v9 = vand.u32 127, %v56_v8  ;;  %v59_v10 = vshrl.u32 %v56_v8, 7  ;;  %vm69_vm3 = vcmask 58368   ;;  %s175_s1 = sshll.u32 %s252_s0, 4  ;;  %s176_s1 = int_to_ptr.vmem [resolvable:$true] %s175_s1 }
  0x11   :  { %v47_v5 = vsel %vm46_vm0, %v44_v3, 0.0  ;;  %v250_v18 = vmov 0   ;;  %v251_v19 = vmov 0.0   ;;  %vm33_vm4 = vcmask 254976   ;;  %s222_s18 = scalar_lea.vmem %s176_s1, 32  ;;  %p227_p6 = scmp.lt.s32.totalorder %s176_s1, %s176_s1 }
  0x12   :  { %48 = vadd.xlane.f32.xlu0 %v47_v5  ;;  %v50_v6 = vsel %vm46_vm0, %v45_v4, 0.0  ;;  %v60_v12 = vsub.s32 %v57_v9, %v59_v10  ;;  %192 = vset.pattern.permute.xlu1 %v250_v18  ;;  %32 = vst.msk [vmem:[#allocation3] sm:$0x3] %vm30_vm1, %v251_v19  ;;  %v83_v24 = vsub.s32 0, %v59_v10  ;;  %v87_v25 = vsub.s32 1, %v59_v10  ;;  %p223_p5 = scmp.ne.s32.totalorder %s176_s1, %s222_s18  ;;  %p228_p7 = scmp.lt.s32.totalorder %s222_s18, %s222_s18 }
  0x13   :  { %193 = vset.pattern.permute.xlu0 %v250_v18  ;;  %34 = vst.msk [vmem:[#allocation4] sm:$0x3] %vm33_vm4, %v251_v19 }
  0x14   :  { %p229_p8 = por %p228_p7, %p227_p6 }
  0x16   :  { %51 = vadd.xlane.f32.xlu0 %v50_v6  ;;  %p230_p9 = pnand %p229_p8, %p223_p5 }
  0x17   :  { %v53_v20 = vld [vmem:[#allocation2] sm:$0x3] }
  0x19   :  { %v97_v43 = vld [vmem:[#allocation3] sm:$0x3] }
  0x1a   :  { %v123_v63 = vld [vmem:[#allocation4] sm:$0x3] }
  0x9b   :  { %v49_v11 = vpop.xlane.xlu0 %48 }
  0x9c   :  { %v61_v14 = vrot.slane %v49_v11, %v60_v12 }
  0x9f   :  { %v52_v13 = vpop.xlane.xlu0 %51 }
  0xa0   :  { %v65_v15 = vrot.slane %v52_v13, %v60_v12 }
  0xa2   :  { %v67_v16 = vsel %vm66_vm2, %v65_v15, %v61_v14 }
  0xa3   :  { %v70_v17 = vsel %vm69_vm3, %v67_v16, -inf }
  0xa4   :  { %71 = vmax.xlane.f32.xlu1 %v70_v17 }
 0x12d   :  { %v72_v21 = vpop.xlane.xlu1 %71 }
 0x12e   :  { %v73_v22 = vmax.f32 %v53_v20, %v72_v21 }
 0x130   :  { %v74_v23 = vsub.f32 %v53_v20, %v73_v22  ;;  %155 = vst.msk [vmem:[#allocation2] sm:$0x3] %vm30_vm1, %v73_v22  ;;  %79 = vperm.xlu1 %192, %v73_v22  }
 0x132   :  { %v75_v41 = vmul.f32 1.442695, %v74_v23 }
 0x1ab   :  { %v80_v26 = vpop.permute.xlu1 %79 }
 0x1ac   :  { %v84_v27 = vrot.slane %v80_v26, %v83_v24  ;;  %v88_v28 = vrot.slane %v80_v26, %v87_v25 }
 0x1ae   :  { %v91_v29 = vsub.f32 %v49_v11, %v84_v27  ;;  %v92_v30 = vsub.f32 %v52_v13, %v88_v28 }
 0x1b0   :  { %v93_v31 = vmul.f32 1.442695, %v91_v29  ;;  %v95_v32 = vmul.f32 1.442695, %v92_v30 }
 0x1b2   :  { %194 = vpow2.f32 %v93_v31 }
 0x1b3   :  { %196 = vpow2.f32 %v95_v32 }
 0x1b4   :  { %198 = vpow2.f32 %v75_v41 }
 0x1bf   :  { %v195_v33 = vpop.eup %194 }
 0x1c0   :  { %v197_v34 = vpop.eup %196  ;;  %102 = vperm.xlu0 %193, %v195_v33  }
 0x1c1   :  { %105 = vperm.xlu1 %192, %v197_v34   ;;  %v199_v42 = vpop.eup %198 }
 0x1c2   :  { %v98_v44 = vmul.f32 %v199_v42, %v97_v43 }
 0x23b   :  { %v103_v35 = vpop.permute.xlu0 %102 }
 0x23c   :  { %v106_v36 = vpop.permute.xlu1 %105  ;;  %v110_v37 = vrot.slane %v103_v35, %v60_v12  ;;  %v132_v49 = vmul.f32 %v103_v35, %v271_v0 }
 0x23d   :  { %v114_v38 = vrot.slane %v106_v36, %v60_v12  ;;  %v133_v48 = vmul.f32 %v106_v36, %v276_v2 }
 0x23e   :  { %v134_v51 = vsel %vm46_vm0, %v132_v49, 0.0 }
 0x23f   :  { %v115_v39 = vsel %vm66_vm2, %v114_v38, %v110_v37  ;;  %v141_v50 = vsel %vm46_vm0, %v133_v48, 0.0  ;;  %v135_v53 = vrot.slane %v134_v51, 4 }
 0x240   :  { %v117_v40 = vsel %vm69_vm3, %v115_v39, 0.0  ;;  %v142_v52 = vrot.slane %v141_v50, 4 }
 0x241   :  { %118 = vadd.xlane.f32.xlu1 %v117_v40  ;;  %v136_v55 = vadd.f32 %v135_v53, %v134_v51 }
 0x242   :  { %v143_v54 = vadd.f32 %v142_v52, %v141_v50 }
 0x243   :  { %v137_v57 = vrot.slane %v136_v55, 2 }
 0x244   :  { %v144_v56 = vrot.slane %v143_v54, 2 }
 0x245   :  { %v138_v59 = vadd.f32 %v137_v57, %v136_v55 }
 0x246   :  { %v145_v58 = vadd.f32 %v144_v56, %v143_v54 }
 0x247   :  { %v139_v61 = vrot.slane %v138_v59, 1 }
 0x248   :  { %v146_v60 = vrot.slane %v145_v58, 1 }
 0x249   :  { %v140_v1 = vadd.f32 %v139_v61, %v138_v59 }
 0x24a   :  { %v147_v2 = vadd.f32 %v146_v60, %v145_v58 }
 0x24c   :  { %v150_v4 = vsel %vm66_vm2, %v147_v2, %v140_v1 }
 0x2ca   :  { %v119_v45 = vpop.xlane.xlu1 %118 }
 0x2cb   :  { %v120_v46 = vadd.f32 %v119_v45, %v98_v44 }
 0x2cd   :  { %122 = vst.msk [vmem:[#allocation3] sm:$0x3] %vm30_vm1, %v120_v46 }
 0x2d4   :  { %v160_v47 = vld [vmem:[#allocation3] sm:$0x3] }
 0x2d5   :  { %163 = vperm.xlu0 %193, %v160_v47  }
 0x2d9   :  { %126 = vperm.xlu0 %193, %v199_v42  }
 0x350   :  { %v164_v62 = vpop.permute.xlu0 %163 }
 0x351   :  { %200 = vrcp.f32 %v164_v62 }
 0x354   :  { %v127_v0 = vpop.permute.xlu0 %126 }
 0x355   :  { %v129_v3 = vmul.f32 %v127_v0, %v123_v63 }
 0x357   :  { %v152_v5 = vadd.f32 %v150_v4, %v129_v3 }
 0x359   :  { %154 = vst.msk [vmem:[#allocation4] sm:$0x3] %vm33_vm4, %v152_v5 }
 0x35e   :  { %v201_v6 = vpop.eup %200 }
 0x360   :  { %v159_v7 = vld [vmem:[#allocation4] sm:$0x3] }
 0x361   :  { %v167_v8 = vmul.f32 %v201_v6, %v159_v7 }
 0x363   :  { %168 = vst.msk [vmem:[#allocation8] sm:$0x3] %vm33_vm4, %v167_v8 }
 0x364   :  { %233 = shalt.err (!%p230_p9)
}
 0x365   :  { %178 = dma.vmem_to_hbm [thread:$0]  %s176_s1, 32, %s303_s2, [#allocation7]  }
 0x366   :  { %244 = dma.done.wait [#allocation7], 32  }
 0x367   :  { %245 = vsyncadd [#allocation7], 4294967264 }
 0x368   :  { %182 = vsyncpa [#allocation6], 1 }
 0x369   :  { %183 = vsyncpa [#allocation7], 1 }

</bundles_post_ra>
